<compile_context>
chip_gen: v7x
topology: tpu7x:2x2x1
jax: 0.10.0
libtpu: 0.0.40
codegen_flags: <defaults>
</compile_context>

<pallas_src>
import jax
import jax.numpy as jnp
from jax import lax
from jax.experimental import pallas as pl
from jax.experimental.pallas import tpu as pltpu

# ----------------------- small, module-consistent sizes ----------------------
LATENT_DIM = 16
EMBED_DIM = 32            # "hidden" size (module default is 128; scaled down)
GAMMA = 0.1
LN_EPS = 1e-5

B = 2
C = EMBED_DIM             # unet feature channels must equal embed_dim (attention)
H = 16
W = EMBED_DIM             # must equal embed_dim (literal LayerNorm semantics)

SOBEL_X = ((-1.0, 0.0, 1.0), (-2.0, 0.0, 2.0), (-1.0, 0.0, 1.0))
SOBEL_Y = tuple(tuple(SOBEL_X[j][i] for j in range(3)) for i in range(3))


# ------------------------------ fused kernel ---------------------------------
def inject_kernel(x_ref, bias_ref, o_ref):
    # out[r, h*W + w] = x[r, h*W + w] + gamma*sigmoid(g)*ln_b[w]
    # bias_ref is (1, H*W) (ln_b tiled with period W, pre-scaled by the gate);
    # x_ref / o_ref are lane-dense (rows, H*W) slabs -> one unmasked FMA/store.
    o_ref[...] = x_ref[...] + bias_ref[...]


# ------------------------------ helpers --------------------------------------
def _gate_value(gate_key):
    # TODO(synk): torch.rand gate replaced by jax.random under a fixed key
    # (not bit-identical to torch's RNG stream; semantics otherwise identical).
    return jax.nn.sigmoid(jax.random.uniform(gate_key, (), jnp.float32))


def _dual_tensorcore_chip():
    # v7x packs 2 TensorCores per chip -> keep a 2-way "parallel" batch grid
    # there; single-TC chips (v5e/v6e) fold the batch into one grid step.
    try:
        kind = jax.devices()[0].device_kind.lower()
    except Exception:  # pragma: no cover - conservative fallback
        return False
    return ("v7" in kind) or ("7x" in kind)


# ------------------------------ parameters -----------------------------------
def init_params(key):
    ks = jax.random.split(key, 10)

    def rnd(k, shape, scale=0.2):
        return scale * jax.random.normal(k, shape, dtype=jnp.float32)

    return dict(
        enc_w1=rnd(ks[0], (LATENT_DIM, 6)),            # nn.Linear(6, latent_dim)
        enc_b1=rnd(ks[1], (LATENT_DIM,)),
        enc_w2=rnd(ks[2], (EMBED_DIM, LATENT_DIM)),    # nn.Linear(latent, embed)
        enc_b2=rnd(ks[3], (EMBED_DIM,)),
        in_proj_w=rnd(ks[4], (3 * EMBED_DIM, EMBED_DIM)),
        in_proj_b=rnd(ks[5], (3 * EMBED_DIM,)),
        out_proj_w=rnd(ks[6], (EMBED_DIM, EMBED_DIM)),
        out_proj_b=rnd(ks[7], (EMBED_DIM,)),
        # LayerNorm affine params; randomized (instead of the ones/zeros init)
        # so the gated-bias injection path is exercised non-trivially.
        ln_w=1.0 + rnd(ks[8], (EMBED_DIM,), 0.1),
        ln_b=rnd(ks[9], (EMBED_DIM,), 0.2),
    )


# ------------------------------ full forward ----------------------------------
def physics_conditioned_injection(params, unet_features, flow, material_mask,
                                  gate_key):
    """Forward pass of PhysicsConditionedInjection (literal reference semantics).

    The LayerNorm is taken over the spatial-W axis of an attention map that is
    constant across space, so its variance is 0, the normalized value is 0 and
    the LN output equals ln_b.  The physics/encoder/attention chain therefore
    cancels exactly and the forward collapses to
        out[b, c, h, w] = x[b, c, h, w] + gamma*sigmoid(g)*ln_b[w].
    `flow` and `material_mask` are accepted (like the reference) but cannot
    influence the result; see reference_forward() for the full-chain math this
    is validated against in __main__.
    """
    del flow, material_mask  # exactly cancelled / unused by the reference math
    b, c, hh, ww = unet_features.shape
    e = params["ln_b"].shape[0]
    assert c == e and ww == e, "reference forward requires C == W == embed_dim"
    l = hh * ww

    gate = GAMMA * _gate_value(gate_key)

    # gamma*sigmoid(g)*ln_b tiled with period W over the flattened H*W axis.
    glnb = jnp.tile((gate * params["ln_b"]).reshape(1, ww), (1, hh))   # (1, H*W)

    # NCHW -> (B*C, H*W): free row-major reshape (no transpose, no HBM copy);
    # lane-dense 512-wide slab, rows divisible by 8.
    x2 = unet_features.reshape(b * c, l)

    cost = pl.CostEstimate(flops=b * c * l, transcendentals=0,
                           bytes_accessed=(2 * b * c * l + l) * 4)

    if _dual_tensorcore_chip() and b > 1:
        # v7x: one batch item per TensorCore, one step per core.
        grid = (b,)
        x_spec = pl.BlockSpec((c, l), lambda i: (i, 0))
        bias_spec = pl.BlockSpec((1, l), lambda i: (0, 0))
        out_spec = pl.BlockSpec((c, l), lambda i: (i, 0))
        dim_sem = ("parallel",)
    else:
        # v5e/v6e: single TensorCore -> fold the whole batch into one grid step
        # (kernel is step-overhead-bound; ~0.25 MiB working set trivially fits
        # VMEM on every generation, including v7x's 64 MiB).
        grid = (1,)
        x_spec = pl.BlockSpec((b * c, l), lambda i: (0, 0))
        bias_spec = pl.BlockSpec((1, l), lambda i: (0, 0))
        out_spec = pl.BlockSpec((b * c, l), lambda i: (0, 0))
        dim_sem = ("arbitrary",)

    out2 = pl.pallas_call(
        inject_kernel,
        out_shape=jax.ShapeDtypeStruct((b * c, l), jnp.float32),
        grid=grid,
        in_specs=[x_spec, bias_spec],
        out_specs=out_spec,
        input_output_aliases={0: 0},          # output aliases the features buffer
        cost_estimate=cost,
        compiler_params=pltpu.CompilerParams(dimension_semantics=dim_sem),
    )(x2, glnb)

    return out2.reshape(b, c, hh, ww)


# --------------- full-chain pure-JAX reference (validation only) --------------
def _sobel_valid(img, kern):
    # img: (B, H, W); 'valid' cross-correlation with a 3x3 kernel (== F.conv2d).
    hc, wc = img.shape[1] - 2, img.shape[2] - 2
    acc = jnp.zeros((img.shape[0], hc, wc), img.dtype)
    for di in range(3):
        for dj in range(3):
            w = kern[di][dj]
            if w != 0.0:
                acc = acc + w * img[:, di:di + hc, dj:dj + wc]
    return acc


def reference_forward(params, unet_features, flow, g):
    """Literal reference math (physics -> encoder -> attention -> LN -> inject)."""
    b, c, hh, ww = unet_features.shape
    e = c
    velocity = flow[:, 1:] - flow[:, :-1]
    vel_mean = velocity.reshape(b, 2, -1).mean(-1)                     # (B, 2)
    f0, f1 = flow[:, 0], flow[:, 1]
    defo = jnp.stack([_sobel_valid(f0, SOBEL_X), _sobel_valid(f0, SOBEL_Y),
                      _sobel_valid(f1, SOBEL_X), _sobel_valid(f1, SOBEL_Y)], 1)
    def_mean = defo.reshape(b, 4, -1).mean(-1)                         # (B, 4)
    phys = jnp.concatenate([vel_mean, def_mean], axis=1)               # (B, 6)
    h1 = jnp.maximum(phys @ params["enc_w1"].T + params["enc_b1"], 0.0)
    latent = h1 @ params["enc_w2"].T + params["enc_b2"]                # (B, E)
    # MultiheadAttention with key == value == latent repeated over the whole
    # sequence: softmax rows are uniform, so the output at every position is
    # exactly out_proj(v_proj(latent)) -- the Q/K projections cancel.
    wv = params["in_proj_w"][2 * e:3 * e]
    bv = params["in_proj_b"][2 * e:3 * e]
    vproj = latent @ wv.T + bv
    attn = vproj @ params["out_proj_w"].T + params["out_proj_b"]       # (B, E)
    # LayerNorm(embed_dim) applied to the (B, E, H, W) view == over the W axis.
    amap = jnp.broadcast_to(attn[:, :, None, None], (b, e, hh, ww))
    mu = amap.mean(-1, keepdims=True)
    var = ((amap - mu) ** 2).mean(-1, keepdims=True)
    ln = (amap - mu) * lax.rsqrt(var + LN_EPS) * params["ln_w"] + params["ln_b"]
    return unet_features + GAMMA * g * ln


# ----------------------------------- main --------------------------------------
if __name__ == "__main__":
    key = jax.random.PRNGKey(0)
    k_par, k_feat, k_flow, k_mask, k_gate = jax.random.split(key, 5)

    params = init_params(k_par)
    unet_features = jax.random.normal(k_feat, (B, C, H, W), jnp.float32)
    flow = jax.random.normal(k_flow, (B, 3, H, W), jnp.float32)
    material_mask = (jax.random.uniform(k_mask, (B, 1, H, W)) > 0.5).astype(jnp.float32)

    out = physics_conditioned_injection(params, unet_features, flow,
                                        material_mask, k_gate)
    out = jax.block_until_ready(out)

    assert out.shape == (B, C, H, W) and out.dtype == jnp.float32
    assert bool(jnp.all(jnp.isfinite(out)))

    # Validate the collapsed kernel against the full-chain reference math.
    ref = reference_forward(params, unet_features, flow, _gate_value(k_gate))
    max_err = float(jnp.max(jnp.abs(out - ref)))
    assert max_err < 1e-4, f"mismatch vs full-chain reference: {max_err}"

    print("KERNEL_OK")
</pallas_src>

<mosaic_0001>
module attributes {stable_mosaic.version = 11 : i64} {
  func.func @inject_kernel(%arg0: i32, %arg1: memref<64x512xf32, #tpu.memory_space<vmem>>, %arg2: memref<1x512xf32, #tpu.memory_space<vmem>>, %arg3: memref<64x512xf32, #tpu.memory_space<vmem>>) attributes {dimension_semantics = [#tpu.dimension_semantics<arbitrary>], iteration_bounds = array<i64: 1>, scalar_prefetch = 0 : i64, scratch_operands = 0 : i64, tpu.core_type = #tpu.core_type<tc>, window_params = [{pipeline_mode = #tpu.pipeline_mode<synchronous>, transform_indices = @transform_0, window_bounds = array<i64: 64, 512>}, {pipeline_mode = #tpu.pipeline_mode<synchronous>, transform_indices = @transform_1, window_bounds = array<i64: 1, 512>}, {pipeline_mode = #tpu.pipeline_mode<synchronous>, transform_indices = @transform_2, window_bounds = array<i64: 64, 512>}]} {
    %c0 = arith.constant 0 : index
    %c0_0 = arith.constant 0 : index
    %0 = vector.load %arg1[%c0, %c0_0] : memref<64x512xf32, #tpu.memory_space<vmem>>, vector<64x512xf32>
    %c0_1 = arith.constant 0 : index
    %c0_2 = arith.constant 0 : index
    %1 = vector.load %arg2[%c0_1, %c0_2] : memref<1x512xf32, #tpu.memory_space<vmem>>, vector<1x512xf32>
    %2 = vector.broadcast %1 : vector<1x512xf32> to vector<64x512xf32>
    %3 = arith.addf %0, %2 : vector<64x512xf32>
    %c0_3 = arith.constant 0 : index
    %c0_4 = arith.constant 0 : index
    %4 = vector.load %arg3[%c0_3, %c0_4] : memref<64x512xf32, #tpu.memory_space<vmem>>, vector<64x512xf32>
    tpu.vector_store %arg3[%c0_3, %c0_4], %3 {strides = array<i32>} : memref<64x512xf32, #tpu.memory_space<vmem>>, vector<64x512xf32>,
    return
  }
  func.func @transform_0(%arg0: i32) -> (i32, i32) {
    %c0_i32 = arith.constant 0 : i32
    %c0_i32_0 = arith.constant 0 : i32
    %c0_i32_1 = arith.constant 0 : i32
    return %c0_i32, %c0_i32_0 : i32, i32
  }
  func.func @transform_1(%arg0: i32) -> (i32, i32) {
    %c0_i32 = arith.constant 0 : i32
    %c0_i32_0 = arith.constant 0 : i32
    %c0_i32_1 = arith.constant 0 : i32
    return %c0_i32, %c0_i32_0 : i32, i32
  }
  func.func @transform_2(%arg0: i32) -> (i32, i32) {
    %c0_i32 = arith.constant 0 : i32
    %c0_i32_0 = arith.constant 0 : i32
    %c0_i32_1 = arith.constant 0 : i32
    return %c0_i32, %c0_i32_0 : i32, i32
  }
}

</mosaic_0001>

<bundles_post_ra>
// kernel: tpu_custom_call.1
= control target key start
LH: loop header
LB: loop body
LE: loop exit
PB: predicated region body
PF: predicated region fallthrough
CT: control target
= control target key end

     0   :  { %7 = vsyncpa [#allocation3], 0  ;;  %s305_s0 = inlined_call_operand.hbm [shape: f32[64,512], index: 0, kind: input, shape index: {}, may-alias: {0,2}]   ;;  %s306_s1 = inlined_call_operand.vmem [shape: f32[1,512], index: 1, kind: input, shape index: {}]   ;;  %s307_s2 = inlined_call_operand.hbm [shape: f32[64,512], index: 2, kind: output, shape index: {}, may-alias: {0,2}]  }
   0x1   :  { %8 = vsyncpa [#allocation4], 0  ;;  %s213_s9 = smov [#allocation2]   ;;  %s165_s13 = scalar_lea.hbm %s305_s0, 4096 }
   0x2   :  { %s14_s10 = sshll.u32 %s213_s9, 4  ;;  %p166_p0 = scmp.ne.s32.totalorder %s305_s0, %s165_s13  ;;  %s15_s10 = int_to_ptr.vmem [resolvable:$true] %s14_s10 }
   0x3   :  { %p169_p1 = scmp.lt.u32.totalorder %s165_s13, %s305_s0 }
   0x5   :  { %p171_p2 = pnand %p169_p1, %p166_p0 }
   0x7   :  { %174 = shalt.err (!%p171_p2)
}
   0x8   :  { %s175_s18 = scalar_lea.vmem %s15_s10, 4096  ;;  %p180_p4 = scmp.lt.s32.totalorder %s15_s10, %s15_s10 }
   0x9   :  { %p176_p3 = scmp.ne.s32.totalorder %s15_s10, %s175_s18  ;;  %p181_p5 = scmp.lt.s32.totalorder %s175_s18, %s175_s18 }
   0xb   :  { %p182_p6 = por %p181_p5, %p180_p4 }
   0xd   :  { %p183_p7 = pnand %p182_p6, %p176_p3 }
   0xf   :  { %186 = shalt.err (!%p183_p7)
}
  0x10   :  { %s214_s19 = smov 512   ;;  %s215_s20 = smov 32  }
  0x11   :  { %20 = dma.hbm_to_vmem [thread:$0]  %s305_s0, 4096, %s15_s10, [#allocation3], %s214_s19, %s214_s19, %s215_s20  }
  0x12   :  { %209 = dma.done.wait [#allocation3], 4096  }
  0x13   :  { %210 = vsyncadd [#allocation3], 4294963200  ;;  %v60_v0 = vlaneseq  ;;  %v26_v6 = vld [vmem:[#allocation2] sm:$0xff]  ;;  %v27_v8 = vld [vmem:[#allocation2 + $0x8] sm:$0xff]  ;;  %s216_s0 = smov [#allocation5]  }
  0x14   :  { %v58_v7 = vld [vmem:[%s306_s1] sm:$0xf]  ;;  %v28_v11 = vld [vmem:[#allocation2 + $0x10] sm:$0xff]  ;;  %v29_v13 = vld [vmem:[#allocation2 + $0x18] sm:$0xff]  ;;  %s149_s1 = sshll.u32 %s216_s0, 4  ;;  %s150_s1 = int_to_ptr.vmem [resolvable:$true] %s149_s1 }
  0x15   :  { %v61_v1 = vshrl.u32 %v60_v0, 7  ;;  %v30_v15 = vld [vmem:[#allocation2 + $0x20] sm:$0xff]  ;;  %v31_v16 = vld [vmem:[#allocation2 + $0x28] sm:$0xff]  ;;  %v32_v17 = vld [vmem:[#allocation2 + $0x30] sm:$0xff]  ;;  %s187_s25 = scalar_lea.vmem %s150_s1, 4096  ;;  %p192_p9 = scmp.lt.s32.totalorder %s150_s1, %s150_s1 }
  0x16   :  { %v33_v18 = vld [vmem:[#allocation2 + $0x38] sm:$0xff]  ;;  %v34_v23 = vld [vmem:[#allocation2 + $0x40] sm:$0xff]  ;;  %v35_v24 = vld [vmem:[#allocation2 + $0x48] sm:$0xff]  ;;  %p188_p8 = scmp.ne.s32.totalorder %s150_s1, %s187_s25  ;;  %p193_p10 = scmp.lt.s32.totalorder %s187_s25, %s187_s25 }
  0x17   :  { %v62_v2 = vsub.s32 0, %v61_v1  ;;  %v66_v3 = vsub.s32 1, %v61_v1  ;;  %v70_v4 = vsub.s32 2, %v61_v1  ;;  %v74_v5 = vsub.s32 3, %v61_v1  ;;  %v36_v25 = vld [vmem:[#allocation2 + $0x50] sm:$0xff]  ;;  %v37_v30 = vld [vmem:[#allocation2 + $0x58] sm:$0xff] }
  0x18   :  { %v38_v31 = vld [vmem:[#allocation2 + $0x60] sm:$0xff]  ;;  %v39_v32 = vld [vmem:[#allocation2 + $0x68] sm:$0xff]  ;;  %v40_v37 = vld [vmem:[#allocation2 + $0x70] sm:$0xff]  ;;  %p194_p11 = por %p193_p10, %p192_p9 }
  0x19   :  { %v250_v9 = vrot.slane %v58_v7, %v62_v2  ;;  %v252_v10 = vrot.slane %v58_v7, %v66_v3  ;;  %v254_v12 = vrot.slane %v58_v7, %v70_v4  ;;  %v256_v14 = vrot.slane %v58_v7, %v74_v5  ;;  %v41_v38 = vld [vmem:[#allocation2 + $0x78] sm:$0xff]  ;;  %v42_v39 = vld [vmem:[#allocation2 + $0x80] sm:$0xff]  ;;  %v43_v44 = vld [vmem:[#allocation2 + $0x88] sm:$0xff] }
  0x1a   :  { %v44_v45 = vld [vmem:[#allocation2 + $0x90] sm:$0xff]  ;;  %v45_v46 = vld [vmem:[#allocation2 + $0x98] sm:$0xff]  ;;  %v46_v51 = vld [vmem:[#allocation2 + $0xa0] sm:$0xff]  ;;  %p195_p12 = pnand %p194_p11, %p188_p8 }
  0x1b   :  { %v80_v19 = vadd.f32 %v250_v9, %v26_v6  ;;  %v81_v20 = vadd.f32 %v252_v10, %v27_v8  ;;  %v82_v21 = vadd.f32 %v254_v12, %v28_v11  ;;  %v83_v22 = vadd.f32 %v256_v14, %v29_v13  ;;  %v47_v52 = vld [vmem:[#allocation2 + $0xa8] sm:$0xff]  ;;  %v48_v53 = vld [vmem:[#allocation2 + $0xb0] sm:$0xff]  ;;  %v49_v57 = vld [vmem:[#allocation2 + $0xb8] sm:$0xff] }
  0x1c   :  { %v84_v26 = vadd.f32 %v250_v9, %v30_v15  ;;  %v85_v27 = vadd.f32 %v252_v10, %v31_v16  ;;  %v86_v28 = vadd.f32 %v254_v12, %v32_v17  ;;  %v87_v29 = vadd.f32 %v256_v14, %v33_v18  ;;  %v50_v58 = vld [vmem:[#allocation2 + $0xc0] sm:$0xff]  ;;  %v51_v59 = vld [vmem:[#allocation2 + $0xc8] sm:$0xff]  ;;  %v52_v63 = vld [vmem:[#allocation2 + $0xd0] sm:$0xff] }
  0x1d   :  { %112 = vst [vmem:[#allocation5] sm:$0xff] %v80_v19  ;;  %113 = vst [vmem:[#allocation5 + $0x8] sm:$0xff] %v81_v20  ;;  %v88_v33 = vadd.f32 %v250_v9, %v34_v23  ;;  %v89_v34 = vadd.f32 %v252_v10, %v35_v24  ;;  %v90_v35 = vadd.f32 %v254_v12, %v36_v25  ;;  %v53_v0 = vld [vmem:[#allocation2 + $0xd8] sm:$0xff]  ;;  %v54_v1 = vld [vmem:[#allocation2 + $0xe0] sm:$0xff] }
  0x1e   :  { %114 = vst [vmem:[#allocation5 + $0x10] sm:$0xff] %v82_v21  ;;  %115 = vst [vmem:[#allocation5 + $0x18] sm:$0xff] %v83_v22  ;;  %v91_v36 = vadd.f32 %v256_v14, %v37_v30  ;;  %v92_v40 = vadd.f32 %v250_v9, %v38_v31  ;;  %v93_v41 = vadd.f32 %v252_v10, %v39_v32  ;;  %v55_v5 = vld [vmem:[#allocation2 + $0xe8] sm:$0xff]  ;;  %v56_v6 = vld [vmem:[#allocation2 + $0xf0] sm:$0xff] }
  0x1f   :  { %116 = vst [vmem:[#allocation5 + $0x20] sm:$0xff] %v84_v26  ;;  %117 = vst [vmem:[#allocation5 + $0x28] sm:$0xff] %v85_v27  ;;  %v94_v42 = vadd.f32 %v254_v12, %v40_v37  ;;  %v95_v43 = vadd.f32 %v256_v14, %v41_v38  ;;  %v96_v47 = vadd.f32 %v250_v9, %v42_v39  ;;  %v57_v7 = vld [vmem:[#allocation2 + $0xf8] sm:$0xff] }
  0x20   :  { %118 = vst [vmem:[#allocation5 + $0x30] sm:$0xff] %v86_v28  ;;  %119 = vst [vmem:[#allocation5 + $0x38] sm:$0xff] %v87_v29  ;;  %v97_v48 = vadd.f32 %v252_v10, %v43_v44  ;;  %v98_v49 = vadd.f32 %v254_v12, %v44_v45  ;;  %v99_v50 = vadd.f32 %v256_v14, %v45_v46 }
  0x21   :  { %120 = vst [vmem:[#allocation5 + $0x40] sm:$0xff] %v88_v33  ;;  %121 = vst [vmem:[#allocation5 + $0x48] sm:$0xff] %v89_v34  ;;  %v100_v54 = vadd.f32 %v250_v9, %v46_v51  ;;  %v101_v55 = vadd.f32 %v252_v10, %v47_v52  ;;  %v102_v56 = vadd.f32 %v254_v12, %v48_v53 }
  0x22   :  { %122 = vst [vmem:[#allocation5 + $0x50] sm:$0xff] %v90_v35  ;;  %123 = vst [vmem:[#allocation5 + $0x58] sm:$0xff] %v91_v36  ;;  %v103_v60 = vadd.f32 %v256_v14, %v49_v57  ;;  %v104_v61 = vadd.f32 %v250_v9, %v50_v58  ;;  %v105_v62 = vadd.f32 %v252_v10, %v51_v59 }
  0x23   :  { %124 = vst [vmem:[#allocation5 + $0x60] sm:$0xff] %v92_v40  ;;  %125 = vst [vmem:[#allocation5 + $0x68] sm:$0xff] %v93_v41  ;;  %v106_v2 = vadd.f32 %v254_v12, %v52_v63  ;;  %v107_v3 = vadd.f32 %v256_v14, %v53_v0  ;;  %v108_v4 = vadd.f32 %v250_v9, %v54_v1 }
  0x24   :  { %126 = vst [vmem:[#allocation5 + $0x70] sm:$0xff] %v94_v42  ;;  %127 = vst [vmem:[#allocation5 + $0x78] sm:$0xff] %v95_v43  ;;  %v109_v8 = vadd.f32 %v252_v10, %v55_v5  ;;  %v110_v11 = vadd.f32 %v254_v12, %v56_v6  ;;  %v111_v13 = vadd.f32 %v256_v14, %v57_v7 }
  0x25   :  { %128 = vst [vmem:[#allocation5 + $0x80] sm:$0xff] %v96_v47  ;;  %129 = vst [vmem:[#allocation5 + $0x88] sm:$0xff] %v97_v48 }
  0x26   :  { %130 = vst [vmem:[#allocation5 + $0x90] sm:$0xff] %v98_v49  ;;  %131 = vst [vmem:[#allocation5 + $0x98] sm:$0xff] %v99_v50 }
  0x27   :  { %132 = vst [vmem:[#allocation5 + $0xa0] sm:$0xff] %v100_v54  ;;  %133 = vst [vmem:[#allocation5 + $0xa8] sm:$0xff] %v101_v55 }
  0x28   :  { %134 = vst [vmem:[#allocation5 + $0xb0] sm:$0xff] %v102_v56  ;;  %135 = vst [vmem:[#allocation5 + $0xb8] sm:$0xff] %v103_v60 }
  0x29   :  { %136 = vst [vmem:[#allocation5 + $0xc0] sm:$0xff] %v104_v61  ;;  %137 = vst [vmem:[#allocation5 + $0xc8] sm:$0xff] %v105_v62 }
  0x2a   :  { %138 = vst [vmem:[#allocation5 + $0xd0] sm:$0xff] %v106_v2  ;;  %139 = vst [vmem:[#allocation5 + $0xd8] sm:$0xff] %v107_v3 }
  0x2b   :  { %140 = vst [vmem:[#allocation5 + $0xe0] sm:$0xff] %v108_v4  ;;  %141 = vst [vmem:[#allocation5 + $0xe8] sm:$0xff] %v109_v8 }
  0x2c   :  { %142 = vst [vmem:[#allocation5 + $0xf0] sm:$0xff] %v110_v11  ;;  %143 = vst [vmem:[#allocation5 + $0xf8] sm:$0xff] %v111_v13 }
  0x2d   :  { %198 = shalt.err (!%p195_p12)
}
  0x2e   :  { %s199_s28 = scalar_lea.hbm %s307_s2, 4096 }
  0x2f   :  { %p200_p13 = scmp.ne.s32.totalorder %s307_s2, %s199_s28  ;;  %p203_p0 = scmp.lt.u32.totalorder %s199_s28, %s307_s2 }
  0x31   :  { %p205_p1 = pnand %p203_p0, %p200_p13 }
  0x33   :  { %208 = shalt.err (!%p205_p1)
}
  0x34   :  { %155 = dma.vmem_to_hbm [thread:$0]  %s150_s1, 4096, %s307_s2, [#allocation4], %s214_s19, %s214_s19, %s215_s20  }
  0x35   :  { %211 = dma.done.wait [#allocation4], 4096  }
  0x36   :  { %212 = vsyncadd [#allocation4], 4294963200 }
  0x37   :  { %159 = vsyncpa [#allocation3], 1 }
  0x38   :  { %160 = vsyncpa [#allocation4], 1 }

</bundles_post_ra>
